<compile_context>
chip_gen: v5e
topology: v5e:2x2
jax: 0.10.0
libtpu: 0.0.40
codegen_flags: <defaults>
</compile_context>

<pallas_src>
import jax
import jax.numpy as jnp
from jax.experimental import pallas as pl
from jax.experimental.pallas import tpu as pltpu


def _round_up(n, m):
    return ((n + m - 1) // m) * m


def _mlp_kernel(x_ref, w1_ref, b1_ref, w2_ref, b2_ref, w3_ref, b3_ref, out_ref):
    # All activations are (features, batch_tile): batch on the lane axis.
    h1 = jnp.dot(w1_ref[...], x_ref[...], preferred_element_type=jnp.float32)
    h1 = jnp.maximum(h1 + b1_ref[...], 0.0)
    h2 = jnp.dot(w2_ref[...], h1, preferred_element_type=jnp.float32)
    h2 = jnp.maximum(h2 + b2_ref[...], 0.0)
    y = jnp.dot(w3_ref[...], h2, preferred_element_type=jnp.float32) + b3_ref[...]
    out_ref[...] = y.astype(out_ref.dtype)


def _mlp_noise_kernel(x_ref, w1_ref, b1_ref, w2_ref, b2_ref, w3_ref, b3_ref,
                      noise_ref, out_ref):
    h1 = jnp.dot(w1_ref[...], x_ref[...], preferred_element_type=jnp.float32)
    h1 = jnp.maximum(h1 + b1_ref[...], 0.0)
    h2 = jnp.dot(w2_ref[...], h1, preferred_element_type=jnp.float32)
    h2 = jnp.maximum(h2 + b2_ref[...], 0.0)
    y = jnp.dot(w3_ref[...], h2, preferred_element_type=jnp.float32) + b3_ref[...]
    out_ref[...] = (y + noise_ref[...]).astype(out_ref.dtype)


def policy_quad_forward_fb(x_t, params, *, noise=0.1, expl_noise=0.3,
                           is_training=True, explore=False, rng_key=None,
                           batch_tile=4096):
    """Feature-major fused forward.

    x_t: (num_inputs, B) f32.  params in PyTorch orientation: W (out, in),
    b (out,).  Returns (num_outputs, B) f32.  Preferred hot-loop entry point
    (no HBM transpose passes)."""
    w1, b1, w2, b2, w3, b3 = params
    x_t = jnp.asarray(x_t, jnp.float32)
    num_inputs, b = x_t.shape
    num_hidden = w1.shape[0]
    num_outputs = w3.shape[0]

    # gaussian() path selection at trace time (explore > is_training > eval).
    sigma = float(expl_noise) if explore else (float(noise) if is_training else 0.0)

    # Lane-aligned batch tile: big enough to amortize per-grid-step overhead,
    # but keep >=2 grid steps when the batch allows it (v7x megacore sharding).
    batch_tile = max(128, _round_up(int(batch_tile), 128))
    tile = _round_up(max(1, -(-b // 2)), 128)       # ~half the batch, lane-aligned
    tile = min(batch_tile, tile, _round_up(b, 128))
    grid = (pl.cdiv(b, tile),)                      # partial last block is masked

    b1c = b1.reshape(num_hidden, 1)
    b2c = b2.reshape(num_hidden, 1)
    b3c = b3.reshape(num_outputs, 1)

    def resident(shape):                            # VMEM-resident across steps
        return pl.BlockSpec(shape, lambda i: (0, 0))

    x_spec = pl.BlockSpec((num_inputs, tile), lambda i: (0, i))
    out_spec = pl.BlockSpec((num_outputs, tile), lambda i: (0, i))
    weight_specs = [
        resident((num_hidden, num_inputs)),         # W1
        resident((num_hidden, 1)),                  # b1
        resident((num_hidden, num_hidden)),         # W2
        resident((num_hidden, 1)),                  # b2
        resident((num_outputs, num_hidden)),        # W3
        resident((num_outputs, 1)),                 # b3
    ]
    weight_args = (w1, b1c, w2, b2c, w3, b3c)
    cparams = pltpu.CompilerParams(dimension_semantics=("parallel",))
    out_shape = jax.ShapeDtypeStruct((num_outputs, b), jnp.float32)

    if sigma == 0.0:
        # Eval path: noise-free kernel variant (no extra input, no EUP work).
        return pl.pallas_call(
            _mlp_kernel,
            out_shape=out_shape,
            grid=grid,
            in_specs=[x_spec] + weight_specs,
            out_specs=out_spec,
            compiler_params=cparams,
        )(x_t, *weight_args)

    # Training / explore path: gaussian noise drawn with jax.random (replaces
    # torch normal_), added inside the kernel as a batch-tiled input.
    if rng_key is None:
        rng_key = jax.random.PRNGKey(0)
    noise_t = sigma * jax.random.normal(rng_key, (num_outputs, b), jnp.float32)
    noise_spec = pl.BlockSpec((num_outputs, tile), lambda i: (0, i))

    return pl.pallas_call(
        _mlp_noise_kernel,
        out_shape=out_shape,
        grid=grid,
        in_specs=[x_spec] + weight_specs + [noise_spec],
        out_specs=out_spec,
        compiler_params=cparams,
    )(x_t, *weight_args, noise_t)


def policy_quad_forward(x, params, **kwargs):
    """PyTorch-layout entry: x (B, num_inputs) -> (B, num_outputs).
    Hot loops should prefer policy_quad_forward_fb to skip the two transposes."""
    out_t = policy_quad_forward_fb(jnp.asarray(x, jnp.float32).T, params, **kwargs)
    return out_t.T


def init_params(key, num_inputs, num_outputs, num_hidden=24):
    """Mirrors Policy_quad.random_initialize: W ~ U(-0.1, 0.1), b ~ U(0, 1).
    Stored in PyTorch orientation: W (out, in), b (out,)."""
    ks = jax.random.split(key, 6)
    w1 = jax.random.uniform(ks[0], (num_hidden, num_inputs), jnp.float32, -0.1, 0.1)
    b1 = jax.random.uniform(ks[1], (num_hidden,), jnp.float32, 0.0, 1.0)
    w2 = jax.random.uniform(ks[2], (num_hidden, num_hidden), jnp.float32, -0.1, 0.1)
    b2 = jax.random.uniform(ks[3], (num_hidden,), jnp.float32, 0.0, 1.0)
    w3 = jax.random.uniform(ks[4], (num_outputs, num_hidden), jnp.float32, -0.1, 0.1)
    b3 = jax.random.uniform(ks[5], (num_outputs,), jnp.float32, 0.0, 1.0)
    return (w1, b1, w2, b2, w3, b3)


# TODO(synk): the module's RMSprop optimizer / MSELoss training loop is host-side
# PyTorch machinery, not part of forward(); it is intentionally not translated.

if __name__ == "__main__":
    # Small shapes consistent with the module: state dim 4, hidden 24, action dim 2.
    batch = 8
    num_inputs, num_hidden, num_outputs = 4, 24, 2
    noise_sigma = 0.1

    key = jax.random.PRNGKey(0)
    k_param, k_x, k_noise = jax.random.split(key, 3)
    params = init_params(k_param, num_inputs, num_outputs, num_hidden)
    x = jax.random.normal(k_x, (batch, num_inputs), jnp.float32)

    # Pure-JAX reference of the deterministic part of the forward pass.
    w1, b1, w2, b2, w3, b3 = params
    h1 = jnp.maximum(x @ w1.T + b1, 0.0)
    h2 = jnp.maximum(h1 @ w2.T + b2, 0.0)
    ref = h2 @ w3.T + b3

    # 1) eval path (is_training=False, explore=False): no noise -> exact match.
    out_eval = policy_quad_forward(x, params, noise=noise_sigma,
                                   is_training=False, explore=False)
    jax.block_until_ready(out_eval)
    assert out_eval.shape == (batch, num_outputs)
    assert jnp.allclose(out_eval, ref, atol=1e-5), "eval path mismatch vs JAX reference"

    # 2) training path: deterministic MLP + gaussian(0, noise) fused into kernel.
    action = policy_quad_forward(x, params, noise=noise_sigma,
                                 is_training=True, explore=False, rng_key=k_noise)
    jax.block_until_ready(action)
    assert action.shape == (batch, num_outputs)
    resid = action - ref
    assert bool(jnp.all(jnp.isfinite(resid))), "non-finite noise"
    assert float(jnp.max(jnp.abs(resid))) < 1.0, "noise magnitude out of range"
    assert float(jnp.max(jnp.abs(resid))) > 1e-7, "noise was not added"

    # 3) feature-major entry point (no wrapper transposes) agrees with eval path.
    out_fb = policy_quad_forward_fb(x.T, params, is_training=False)
    jax.block_until_ready(out_fb)
    assert jnp.allclose(out_fb.T, ref, atol=1e-5), "feature-major path mismatch"

    print("KERNEL_OK")
</pallas_src>

<mosaic_0001>
module attributes {stable_mosaic.version = 11 : i64} {
  func.func @_mlp_kernel(%arg0: i32, %arg1: memref<4x128xf32, #tpu.memory_space<vmem>>, %arg2: memref<24x4xf32, #tpu.memory_space<vmem>>, %arg3: memref<24x1xf32, #tpu.memory_space<vmem>>, %arg4: memref<24x24xf32, #tpu.memory_space<vmem>>, %arg5: memref<24x1xf32, #tpu.memory_space<vmem>>, %arg6: memref<2x24xf32, #tpu.memory_space<vmem>>, %arg7: memref<2x1xf32, #tpu.memory_space<vmem>>, %arg8: memref<2x128xf32, #tpu.memory_space<vmem>>) attributes {dimension_semantics = [#tpu.dimension_semantics<parallel>], iteration_bounds = array<i64: 1>, scalar_prefetch = 0 : i64, scratch_operands = 0 : i64, tpu.core_type = #tpu.core_type<tc>, window_params = [{transform_indices = @transform_0, window_bounds = array<i64: 4, 128>}, {pipeline_mode = #tpu.pipeline_mode<synchronous>, transform_indices = @transform_1, window_bounds = array<i64: 24, 4>}, {pipeline_mode = #tpu.pipeline_mode<synchronous>, transform_indices = @transform_2, window_bounds = array<i64: 24, 1>}, {pipeline_mode = #tpu.pipeline_mode<synchronous>, transform_indices = @transform_3, window_bounds = array<i64: 24, 24>}, {pipeline_mode = #tpu.pipeline_mode<synchronous>, transform_indices = @transform_4, window_bounds = array<i64: 24, 1>}, {pipeline_mode = #tpu.pipeline_mode<synchronous>, transform_indices = @transform_5, window_bounds = array<i64: 2, 24>}, {pipeline_mode = #tpu.pipeline_mode<synchronous>, transform_indices = @transform_6, window_bounds = array<i64: 2, 1>}, {transform_indices = @transform_7, window_bounds = array<i64: 2, 128>}]} {
    %c0 = arith.constant 0 : index
    %c0_0 = arith.constant 0 : index
    %0 = vector.load %arg2[%c0, %c0_0] : memref<24x4xf32, #tpu.memory_space<vmem>>, vector<24x4xf32>
    %c0_1 = arith.constant 0 : index
    %c0_2 = arith.constant 0 : index
    %1 = vector.load %arg1[%c0_1, %c0_2] : memref<4x128xf32, #tpu.memory_space<vmem>>, vector<4x128xf32>
    %cst = arith.constant dense<0.000000e+00> : vector<24x128xf32>
    %2 = tpu.matmul %0, %1, %cst {dimension_numbers = #tpu.dot_dimension_numbers<[1], [0], [0], [1], [0, 0, 1, 1], [], []>} : vector<24x4xf32>, vector<4x128xf32>, vector<24x128xf32> -> vector<24x128xf32>
    %c0_3 = arith.constant 0 : index
    %c0_4 = arith.constant 0 : index
    %3 = vector.load %arg3[%c0_3, %c0_4] : memref<24x1xf32, #tpu.memory_space<vmem>>, vector<24x1xf32>
    %4 = vector.broadcast %3 : vector<24x1xf32> to vector<24x128xf32>
    %5 = arith.addf %2, %4 : vector<24x128xf32>
    %cst_5 = arith.constant 0.000000e+00 : f32
    %6 = vector.broadcast %cst_5 : f32 to vector<24x128xf32>
    %7 = arith.maximumf %5, %6 : vector<24x128xf32>
    %c0_6 = arith.constant 0 : index
    %c0_7 = arith.constant 0 : index
    %8 = vector.load %arg4[%c0_6, %c0_7] : memref<24x24xf32, #tpu.memory_space<vmem>>, vector<24x24xf32>
    %cst_8 = arith.constant dense<0.000000e+00> : vector<24x128xf32>
    %9 = tpu.matmul %8, %7, %cst_8 {dimension_numbers = #tpu.dot_dimension_numbers<[1], [0], [0], [1], [0, 0, 1, 1], [], []>} : vector<24x24xf32>, vector<24x128xf32>, vector<24x128xf32> -> vector<24x128xf32>
    %c0_9 = arith.constant 0 : index
    %c0_10 = arith.constant 0 : index
    %10 = vector.load %arg5[%c0_9, %c0_10] : memref<24x1xf32, #tpu.memory_space<vmem>>, vector<24x1xf32>
    %11 = vector.broadcast %10 : vector<24x1xf32> to vector<24x128xf32>
    %12 = arith.addf %9, %11 : vector<24x128xf32>
    %cst_11 = arith.constant 0.000000e+00 : f32
    %13 = vector.broadcast %cst_11 : f32 to vector<24x128xf32>
    %14 = arith.maximumf %12, %13 : vector<24x128xf32>
    %c0_12 = arith.constant 0 : index
    %c0_13 = arith.constant 0 : index
    %15 = vector.load %arg6[%c0_12, %c0_13] : memref<2x24xf32, #tpu.memory_space<vmem>>, vector<2x24xf32>
    %cst_14 = arith.constant dense<0.000000e+00> : vector<2x128xf32>
    %16 = tpu.matmul %15, %14, %cst_14 {dimension_numbers = #tpu.dot_dimension_numbers<[1], [0], [0], [1], [0, 0, 1, 1], [], []>} : vector<2x24xf32>, vector<24x128xf32>, vector<2x128xf32> -> vector<2x128xf32>
    %c0_15 = arith.constant 0 : index
    %c0_16 = arith.constant 0 : index
    %17 = vector.load %arg7[%c0_15, %c0_16] : memref<2x1xf32, #tpu.memory_space<vmem>>, vector<2x1xf32>
    %18 = vector.broadcast %17 : vector<2x1xf32> to vector<2x128xf32>
    %19 = arith.addf %16, %18 : vector<2x128xf32>
    %c0_17 = arith.constant 0 : index
    %c0_18 = arith.constant 0 : index
    %20 = vector.load %arg8[%c0_17, %c0_18] : memref<2x128xf32, #tpu.memory_space<vmem>>, vector<2x128xf32>
    tpu.vector_store %arg8[%c0_17, %c0_18], %19 {strides = array<i32>} : memref<2x128xf32, #tpu.memory_space<vmem>>, vector<2x128xf32>,
    return
  }
  func.func @transform_0(%arg0: i32) -> (i32, i32) {
    %c0_i32 = arith.constant 0 : i32
    %c0_i32_0 = arith.constant 0 : i32
    return %c0_i32, %arg0 : i32, i32
  }
  func.func @transform_1(%arg0: i32) -> (i32, i32) {
    %c0_i32 = arith.constant 0 : i32
    %c0_i32_0 = arith.constant 0 : i32
    %c0_i32_1 = arith.constant 0 : i32
    return %c0_i32, %c0_i32_0 : i32, i32
  }
  func.func @transform_2(%arg0: i32) -> (i32, i32) {
    %c0_i32 = arith.constant 0 : i32
    %c0_i32_0 = arith.constant 0 : i32
    %c0_i32_1 = arith.constant 0 : i32
    return %c0_i32, %c0_i32_0 : i32, i32
  }
  func.func @transform_3(%arg0: i32) -> (i32, i32) {
    %c0_i32 = arith.constant 0 : i32
    %c0_i32_0 = arith.constant 0 : i32
    %c0_i32_1 = arith.constant 0 : i32
    return %c0_i32, %c0_i32_0 : i32, i32
  }
  func.func @transform_4(%arg0: i32) -> (i32, i32) {
    %c0_i32 = arith.constant 0 : i32
    %c0_i32_0 = arith.constant 0 : i32
    %c0_i32_1 = arith.constant 0 : i32
    return %c0_i32, %c0_i32_0 : i32, i32
  }
  func.func @transform_5(%arg0: i32) -> (i32, i32) {
    %c0_i32 = arith.constant 0 : i32
    %c0_i32_0 = arith.constant 0 : i32
    %c0_i32_1 = arith.constant 0 : i32
    return %c0_i32, %c0_i32_0 : i32, i32
  }
  func.func @transform_6(%arg0: i32) -> (i32, i32) {
    %c0_i32 = arith.constant 0 : i32
    %c0_i32_0 = arith.constant 0 : i32
    %c0_i32_1 = arith.constant 0 : i32
    return %c0_i32, %c0_i32_0 : i32, i32
  }
  func.func @transform_7(%arg0: i32) -> (i32, i32) {
    %c0_i32 = arith.constant 0 : i32
    %c0_i32_0 = arith.constant 0 : i32
    return %c0_i32, %arg0 : i32, i32
  }
}

</mosaic_0001>

<bundles_post_ra>
// kernel: tpu_custom_call.1
= control target key start
LH: loop header
LB: loop body
LE: loop exit
PB: predicated region body
PF: predicated region fallthrough
CT: control target
= control target key end

     0   :  { %vm59_vm0 = vcmask 1043456   ;;  %v242_v3 = vmov 0   ;;  %vm49_vm1 = vcmask 31744   ;;  %s336_s0 = inlined_call_operand.vmem [shape: f32[4,8], index: 0, kind: input, shape index: {}]   ;;  %s337_s1 = inlined_call_operand.vmem [shape: f32[24,4], index: 1, kind: input, shape index: {}]   ;;  %s338_s2 = inlined_call_operand.vmem [shape: f32[24,1], index: 2, kind: input, shape index: {}]   ;;  %s339_s3 = inlined_call_operand.vmem [shape: f32[24,24], index: 3, kind: input, shape index: {}]   ;;  %s340_s4 = inlined_call_operand.vmem [shape: f32[24,1], index: 4, kind: input, shape index: {}]   ;;  %s341_s5 = inlined_call_operand.vmem [shape: f32[2,24], index: 5, kind: input, shape index: {}]   ;;  %s342_s6 = inlined_call_operand.vmem [shape: f32[2,1], index: 6, kind: input, shape index: {}]   ;;  %s343_s7 = inlined_call_operand.hbm [shape: f32[2,8], index: 7, kind: output, shape index: {}]  }
   0x1   :  { %v30_v0 = vld [vmem:[%s336_s0] sm:$0xf]  ;;  %v33_v1 = vld [vmem:[%s338_s2 + $0x10] sm:$0xff]  ;;  %213 = vset.pattern.permute.xlu0 %v242_v3 }
   0x2   :  { %v27_v2 = vld [vmem:[%s337_s1] sm:$0xff]  ;;  %199 = vmatpush.msk.msra.mxu0 %vm59_vm0, %v30_v0  ;;  %v29_v4 = vld [vmem:[%s337_s1 + $0x10] sm:$0xff]  ;;  %207 = vmatpush.msk.msra.mxu1 %vm59_vm0, %v30_v0 }
   0x3   :  { %46 = vperm.xlu0 %213, %v33_v1   ;;  %v31_v5 = vld [vmem:[%s338_s2] sm:$0xff]  ;;  %200 = vmatmul.msk.f32.vlgmr.msra.gmra.mxu0 %vm49_vm1, %v27_v2 }
   0x4   :  { %202 = vmatmul.msk.f32.vlgmr.msra.gmra.mxu1 %vm49_vm1, %v29_v4 }
   0x5   :  { %12 = vsyncpa [#allocation3], 0  ;;  %214 = vset.pattern.permute.xlu1 %v242_v3  ;;  %215 = vset.pattern.permute.xlu2 %v242_v3  ;;  %v32_v6 = vld [vmem:[%s338_s2 + $0x8] sm:$0xff]  ;;  %v97_v8 = vld [vmem:[%s340_s4 + $0x10] sm:$0xff]  ;;  %vm113_vm2 = vcmask 195584   ;;  %s190_s29 = sshll.u32 %s343_s7, 4  ;;  %s191_s29 = int_to_ptr.hbm [resolvable:$true] %s190_s29 }
   0x6   :  { %36 = vperm.xlu1 %214, %v31_v5   ;;  %v28_v7 = vld [vmem:[%s337_s1 + $0x8] sm:$0xff]  ;;  %v153_v9 = vld [vmem:[%s342_s6] sm:$0x3]  ;;  %v94_v26 = vld [vmem:[%s339_s3 + $0x10] sm:$0xff] }
   0x7   :  { %v96_v10 = vld [vmem:[%s340_s4 + $0x8] sm:$0xff]  ;;  %v95_v12 = vld [vmem:[%s340_s4] sm:$0xff] }
   0x8   :  { %105 = vperm.xlu2 %215, %v96_v10   ;;  %v93_v24 = vld [vmem:[%s339_s3 + $0x8] sm:$0xff]  ;;  %v92_v25 = vld [vmem:[%s339_s3] sm:$0xff]  ;;  %s243_s3 = smov [#allocation2]  }
   0x9   :  { %v152_v39 = vld [vmem:[%s341_s5] sm:$0x3]  ;;  %s188_s26 = sshll.u32 %s243_s3, 4  ;;  %s189_s26 = int_to_ptr.vmem [resolvable:$true] %s188_s26 }
   0xb   :  { %41 = vperm.xlu0 %213, %v32_v6   ;;  %201 = vmatmul.msk.f32.gmra.mxu0 %vm49_vm1, %v28_v7 }
   0xe   :  { %110 = vperm.xlu1 %214, %v97_v8  }
  0x10   :  { %100 = vperm.xlu2 %215, %v95_v12  }
  0x13   :  { %156 = vperm.xlu0 %213, %v153_v9  }
  0x62   :  { %v106_v27 = vpop.permute.xlu2 %105 }
  0x6a   :  { %v101_v30 = vpop.permute.xlu2 %100 }
  0x75   :  { %v47_v11 = vpop.permute.xlu0 %46 }
  0x78   :  { %v37_v17 = vpop.permute.xlu1 %36 }
  0x7d   :  { %v42_v18 = vpop.permute.xlu0 %41 }
  0x80   :  { %v80_v13 = vpop.f32.mrf.mxu0  ;;  %v111_v29 = vpop.permute.xlu1 %110 }
  0x81   :  { %v86_v14 = vpop.f32.mrf.mxu1  ;;  %v81_v20 = vadd.f32 %v80_v13, %v37_v17 }
  0x82   :  { %v87_v15 = vadd.f32 %v86_v14, %v47_v11 }
  0x83   :  { %v89_v23 = vmax.f32 %v81_v20, 0.0 }
  0x84   :  { %v91_v16 = vmax.f32 %v87_v15, 0.0 }
  0x85   :  { %v157_v40 = vpop.permute.xlu0 %156 }
  0x86   :  { %136 = vmatpush.msrb.mxu1 %v91_v16  ;;  %208 = vmatpush.msra.mxu3 %v91_v16 }
  0x88   :  { %v83_v19 = vpop.f32.mrf.mxu0 }
  0x89   :  { %v84_v21 = vadd.f32 %v83_v19, %v42_v18 }
  0x8b   :  { %v90_v22 = vmax.f32 %v84_v21, 0.0 }
  0x8d   :  { %137 = vmatpush.msrb.mxu1 %v90_v22  ;;  %209 = vmatpush.msra.mxu3 %v90_v22 }
  0x8f   :  { %138 = vmatpush.msrb.mxu1 %v89_v23  ;;  %210 = vmatpush.msra.mxu3 %v89_v23 }
  0x90   :  { %204 = vmatmul.msk.f32.vlgmr.msra.gmra.mxu3 %vm113_vm2, %v93_v24  ;;  %203 = vmatmul.msk.f32.vlgmr.msrb.gmra.mxu1 %vm113_vm2, %v92_v25 }
  0x98   :  { %205 = vmatmul.msk.f32.gmra.mxu3 %vm113_vm2, %v94_v26 }
 0x10d   :  { %v140_v31 = vpop.f32.mrf.mxu1 }
 0x10e   :  { %v141_v35 = vadd.f32 %v140_v31, %v101_v30 }
 0x110   :  { %v149_v38 = vmax.f32 %v141_v35, 0.0 }
 0x113   :  { %v143_v28 = vpop.f32.mrf.mxu3 }
 0x114   :  { %v144_v33 = vadd.f32 %v143_v28, %v106_v27 }
 0x116   :  { %v150_v37 = vmax.f32 %v144_v33, 0.0 }
 0x11b   :  { %v146_v32 = vpop.f32.mrf.mxu3 }
 0x11c   :  { %v147_v34 = vadd.f32 %v146_v32, %v111_v29 }
 0x11e   :  { %v151_v36 = vmax.f32 %v147_v34, 0.0 }
 0x120   :  { %175 = vmatpush.msra.mxu2 %v151_v36 }
 0x122   :  { %176 = vmatpush.msra.mxu2 %v150_v37 }
 0x124   :  { %177 = vmatpush.msra.mxu2 %v149_v38 }
 0x125   :  { %206 = vmatmul.msk.f32.vlgmr.msra.gmra.mxu2 %vm113_vm2, %v152_v39 }
 0x1a8   :  { %v179_v41 = vpop.f32.mrf.mxu2 }
 0x1a9   :  { %v180_v42 = vadd.f32 %v179_v41, %v157_v40 }
 0x1ab   :  { %182 = vst [vmem:[#allocation2] sm:$0x3] %v180_v42 }
 0x1ac   :  { %193 = dma.vmem_to_hbm [thread:$0]  %s189_s26, 32, %s191_s29, [#allocation3]  }
 0x1ad   :  { %240 = dma.done.wait [#allocation3], 32  }
 0x1ae   :  { %241 = vsyncadd [#allocation3], 4294967264 }
 0x1af   :  { %198 = vsyncpa [#allocation3], 1 }

</bundles_post_ra>
